<compile_context>
chip_gen: v6e
topology: v6e:2x2x1
jax: 0.10.0
libtpu: 0.0.40
codegen_flags: <defaults>
</compile_context>

<pallas_src>
from functools import partial

import jax
import jax.numpy as jnp
from jax.experimental import pallas as pl
from jax.experimental.pallas import tpu as pltpu


N_QUBITS = 7
IN_FEATS = 9                     # board_size**2 = 3*3
QNN_OUT = 2 ** N_QUBITS          # 128 measurement outcomes
IN_PAD = 16                      # input feature lanes after padding (bf16)
LANE = 128                       # lane-dense output width (unmasked vst)


def _round_up(n, m):
    return ((n + m - 1) // m) * m


def _num_tc_per_chip():
    """2 TensorCores per chip on v7x; 1 on v5e/v6e."""
    try:
        kind = jax.devices()[0].device_kind.lower()
    except Exception:
        return 1
    return 2 if "v7" in kind else 1


def cqnn_kernel(x_ref, wf_ref, bf_ref, w2_ref, b2_ref, o_ref):
    x = x_ref[...]                                             # (TB, 16) bf16

    # Fused Linear(9 -> 7) + QNN-surrogate map: logits = x @ W_fused + b_fused
    logits = (jnp.dot(x, wf_ref[...], preferred_element_type=jnp.float32)
              + bf_ref[...])                                   # (TB, 128) f32

    # Softmax -> probability distribution over 2**n_qubits basis states.
    m = jnp.max(logits, axis=-1, keepdims=True)
    e = jnp.exp(logits - m)
    denom = jnp.sum(e, axis=-1, keepdims=True)
    probs = e * pl.reciprocal(denom, approx=True)              # rows sum ~ 1

    # Linear(2**n_qubits -> 9) padded to 128 output lanes, then Tanh.
    y = (jnp.dot(probs.astype(jnp.bfloat16), w2_ref[...],
                 preferred_element_type=jnp.float32)
         + b2_ref[...])                                        # (TB, 128) f32
    o_ref[...] = jnp.tanh(y).astype(o_ref.dtype)               # padded lanes -> 0


def prepare_cqnn_params(params):
    """Once-per-params weight prep: exact algebraic fusion + lane padding + bf16."""
    f32 = jnp.float32
    w1, b1, wq, bq, w2, b2 = (params[k] for k in ("w1", "b1", "wq", "bq", "w2", "b2"))
    w_fused = (w1 @ wq).astype(f32)                            # (9, 128)
    b_fused = (b1 @ wq + bq).astype(f32)                       # (1, 128)
    wf = (jnp.zeros((IN_PAD, QNN_OUT), f32)
          .at[:IN_FEATS, :].set(w_fused).astype(jnp.bfloat16))  # (16, 128) bf16
    w2p = (jnp.zeros((QNN_OUT, LANE), f32)
           .at[:, :IN_FEATS].set(w2).astype(jnp.bfloat16))      # (128, 128) bf16
    b2p = jnp.zeros((1, LANE), f32).at[:, :IN_FEATS].set(b2)    # (1, 128) f32
    return {"wf": wf, "bf": b_fused, "w2p": w2p, "b2p": b2p}


@partial(jax.jit, static_argnames=("batch_tile",))
def cqnn_forward(x, prepped, *, batch_tile=2048):
    """x: (B, 9) float32. prepped: prepare_cqnn_params(...). Returns (B, 9) f32."""
    B = x.shape[0]

    # --- tile selection: big tiles amortize per-step overhead; split only ---
    # --- into >= 2 steps on multi-TC chips (v7x megacore) -------------------
    tile = min(batch_tile, _round_up(B, 16))
    if _num_tc_per_chip() >= 2 and B > 16:
        half = _round_up(-(-B // 2), 16)                       # ceil(B/2), 16-aligned
        tile = min(tile, max(16, half))
    tile = max(16, _round_up(tile, 16))                        # bf16 sublane packing

    # --- pad input to (Bp, 16) bf16: slim HBM reads, arbitrary B supported --
    Bp = _round_up(max(B, tile), tile)
    xp = (jnp.zeros((Bp, IN_PAD), jnp.bfloat16)
          .at[:B, :IN_FEATS].set(x.astype(jnp.bfloat16)))

    wf, bf, w2p, b2p = prepped["wf"], prepped["bf"], prepped["w2p"], prepped["b2p"]

    grid = (Bp // tile,)
    full = lambda arr: pl.BlockSpec(arr.shape, lambda i: (0, 0))

    out = pl.pallas_call(
        cqnn_kernel,
        out_shape=jax.ShapeDtypeStruct((Bp, LANE), jnp.bfloat16),
        grid_spec=pltpu.PrefetchScalarGridSpec(
            num_scalar_prefetch=0,
            grid=grid,
            in_specs=[
                pl.BlockSpec((tile, IN_PAD), lambda i: (i, 0)),  # x (bf16, 16 lanes)
                full(wf), full(bf),                              # fused Linear1 + surrogate
                full(w2p), full(b2p),                            # Linear2 (lane-dense)
            ],
            out_specs=pl.BlockSpec((tile, LANE), lambda i: (i, 0)),
        ),
        compiler_params=pltpu.CompilerParams(
            dimension_semantics=("parallel",),
        ),
    )(xp, wf, bf, w2p, b2p)

    return out[:B, :IN_FEATS].astype(jnp.float32)


def init_params(key):
    """Deterministic init mimicking PyTorch Linear default (U[-1/sqrt(fan_in), ..])."""
    k1, k2, k3, k4, k5, k6 = jax.random.split(key, 6)

    def lin(kw, kb, fan_in, fan_out):
        bound = 1.0 / jnp.sqrt(float(fan_in))
        w = jax.random.uniform(kw, (fan_in, fan_out), jnp.float32, -bound, bound)
        b = jax.random.uniform(kb, (1, fan_out), jnp.float32, -bound, bound)
        return w, b

    w1, b1 = lin(k1, k2, IN_FEATS, N_QUBITS)     # Linear(9, n_qubits)
    wq, bq = lin(k3, k4, N_QUBITS, QNN_OUT)      # QNN surrogate map
    w2, b2 = lin(k5, k6, QNN_OUT, IN_FEATS)      # Linear(2**n_qubits, 9)
    return {"w1": w1, "b1": b1, "wq": wq, "bq": bq, "w2": w2, "b2": b2}


def cqnn_reference(x, params):
    """Pure-JAX f32 reference of the same (surrogate) forward."""
    w1, b1, wq, bq, w2, b2 = (params[k] for k in ("w1", "b1", "wq", "bq", "w2", "b2"))
    h = x @ w1 + b1
    logits = h @ wq + bq
    probs = jax.nn.softmax(logits, axis=-1)
    return jnp.tanh(probs @ w2 + b2)


if __name__ == "__main__":
    key = jax.random.PRNGKey(0)
    kx, kp = jax.random.split(key)

    B = 16
    x = jax.random.normal(kx, (B, IN_FEATS), jnp.float32)   # (batch, 9) board states
    params = init_params(kp)
    prepped = prepare_cqnn_params(params)                    # hoisted weight prep

    out = cqnn_forward(x, prepped)
    out = jax.block_until_ready(out)

    # sanity: shape, tanh range, and agreement with the f32 reference
    assert out.shape == (B, IN_FEATS)
    assert bool(jnp.all(jnp.abs(out) <= 1.0))
    ref = cqnn_reference(x, params)
    assert bool(jnp.max(jnp.abs(out - ref)) < 5e-2), "kernel deviates from reference"
    print("KERNEL_OK")
</pallas_src>

<mosaic_0001>
module attributes {stable_mosaic.version = 11 : i64} {
  func.func @cqnn_kernel(%arg0: i32, %arg1: memref<16x16xbf16, #tpu.memory_space<vmem>>, %arg2: memref<16x128xbf16, #tpu.memory_space<vmem>>, %arg3: memref<1x128xf32, #tpu.memory_space<vmem>>, %arg4: memref<128x128xbf16, #tpu.memory_space<vmem>>, %arg5: memref<1x128xf32, #tpu.memory_space<vmem>>, %arg6: memref<16x128xbf16, #tpu.memory_space<vmem>>) attributes {dimension_semantics = [#tpu.dimension_semantics<parallel>], iteration_bounds = array<i64: 1>, scalar_prefetch = 0 : i64, scratch_operands = 0 : i64, tpu.core_type = #tpu.core_type<tc>, window_params = [{transform_indices = @transform_0, window_bounds = array<i64: 16, 16>}, {pipeline_mode = #tpu.pipeline_mode<synchronous>, transform_indices = @transform_1, window_bounds = array<i64: 16, 128>}, {pipeline_mode = #tpu.pipeline_mode<synchronous>, transform_indices = @transform_2, window_bounds = array<i64: 1, 128>}, {pipeline_mode = #tpu.pipeline_mode<synchronous>, transform_indices = @transform_3, window_bounds = array<i64: 128, 128>}, {pipeline_mode = #tpu.pipeline_mode<synchronous>, transform_indices = @transform_4, window_bounds = array<i64: 1, 128>}, {transform_indices = @transform_5, window_bounds = array<i64: 16, 128>}]} {
    %c0 = arith.constant 0 : index
    %c0_0 = arith.constant 0 : index
    %0 = vector.load %arg1[%c0, %c0_0] : memref<16x16xbf16, #tpu.memory_space<vmem>>, vector<16x16xbf16>
    %c0_1 = arith.constant 0 : index
    %c0_2 = arith.constant 0 : index
    %1 = vector.load %arg2[%c0_1, %c0_2] : memref<16x128xbf16, #tpu.memory_space<vmem>>, vector<16x128xbf16>
    %cst = arith.constant dense<0.000000e+00> : vector<16x128xf32>
    %2 = tpu.matmul %0, %1, %cst {dimension_numbers = #tpu.dot_dimension_numbers<[1], [0], [0], [1], [0, 0, 1, 1], [], []>} : vector<16x16xbf16>, vector<16x128xbf16>, vector<16x128xf32> -> vector<16x128xf32>
    %c0_3 = arith.constant 0 : index
    %c0_4 = arith.constant 0 : index
    %3 = vector.load %arg3[%c0_3, %c0_4] : memref<1x128xf32, #tpu.memory_space<vmem>>, vector<1x128xf32>
    %4 = vector.broadcast %3 : vector<1x128xf32> to vector<16x128xf32>
    %5 = arith.addf %2, %4 : vector<16x128xf32>
    %cst_5 = arith.constant dense<0xFF800000> : vector<16xf32>
    %6 = vector.multi_reduction <maximumf>, %5, %cst_5 [1] : vector<16x128xf32> to vector<16xf32>
    %7 = vector.shape_cast %6 : vector<16xf32> to vector<16x1xf32>
    %8 = vector.broadcast %7 : vector<16x1xf32> to vector<16x128xf32>
    %9 = arith.subf %5, %8 : vector<16x128xf32>
    %10 = math.exp %9 : vector<16x128xf32>
    %cst_6 = arith.constant dense<0.000000e+00> : vector<16xf32>
    %11 = vector.multi_reduction <add>, %10, %cst_6 [1] : vector<16x128xf32> to vector<16xf32>
    %12 = vector.shape_cast %11 : vector<16xf32> to vector<16x1xf32>
    %13 = tpu.reciprocal %12 {approx = true} : vector<16x1xf32> -> vector<16x1xf32>
    %14 = vector.broadcast %13 : vector<16x1xf32> to vector<16x128xf32>
    %15 = arith.mulf %10, %14 : vector<16x128xf32>
    %16 = arith.truncf %15 : vector<16x128xf32> to vector<16x128xbf16>
    %c0_7 = arith.constant 0 : index
    %c0_8 = arith.constant 0 : index
    %17 = vector.load %arg4[%c0_7, %c0_8] : memref<128x128xbf16, #tpu.memory_space<vmem>>, vector<128x128xbf16>
    %cst_9 = arith.constant dense<0.000000e+00> : vector<16x128xf32>
    %18 = tpu.matmul %16, %17, %cst_9 {dimension_numbers = #tpu.dot_dimension_numbers<[1], [0], [0], [1], [0, 0, 1, 1], [], []>} : vector<16x128xbf16>, vector<128x128xbf16>, vector<16x128xf32> -> vector<16x128xf32>
    %c0_10 = arith.constant 0 : index
    %c0_11 = arith.constant 0 : index
    %19 = vector.load %arg5[%c0_10, %c0_11] : memref<1x128xf32, #tpu.memory_space<vmem>>, vector<1x128xf32>
    %20 = vector.broadcast %19 : vector<1x128xf32> to vector<16x128xf32>
    %21 = arith.addf %18, %20 : vector<16x128xf32>
    %22 = math.tanh %21 : vector<16x128xf32>
    %23 = arith.truncf %22 : vector<16x128xf32> to vector<16x128xbf16>
    %c0_12 = arith.constant 0 : index
    %c0_13 = arith.constant 0 : index
    %24 = vector.load %arg6[%c0_12, %c0_13] : memref<16x128xbf16, #tpu.memory_space<vmem>>, vector<16x128xbf16>
    tpu.vector_store %arg6[%c0_12, %c0_13], %23 {strides = array<i32>} : memref<16x128xbf16, #tpu.memory_space<vmem>>, vector<16x128xbf16>,
    return
  }
  func.func @transform_0(%arg0: i32) -> (i32, i32) {
    %c0_i32 = arith.constant 0 : i32
    %c0_i32_0 = arith.constant 0 : i32
    return %arg0, %c0_i32 : i32, i32
  }
  func.func @transform_1(%arg0: i32) -> (i32, i32) {
    %c0_i32 = arith.constant 0 : i32
    %c0_i32_0 = arith.constant 0 : i32
    %c0_i32_1 = arith.constant 0 : i32
    return %c0_i32, %c0_i32_0 : i32, i32
  }
  func.func @transform_2(%arg0: i32) -> (i32, i32) {
    %c0_i32 = arith.constant 0 : i32
    %c0_i32_0 = arith.constant 0 : i32
    %c0_i32_1 = arith.constant 0 : i32
    return %c0_i32, %c0_i32_0 : i32, i32
  }
  func.func @transform_3(%arg0: i32) -> (i32, i32) {
    %c0_i32 = arith.constant 0 : i32
    %c0_i32_0 = arith.constant 0 : i32
    %c0_i32_1 = arith.constant 0 : i32
    return %c0_i32, %c0_i32_0 : i32, i32
  }
  func.func @transform_4(%arg0: i32) -> (i32, i32) {
    %c0_i32 = arith.constant 0 : i32
    %c0_i32_0 = arith.constant 0 : i32
    %c0_i32_1 = arith.constant 0 : i32
    return %c0_i32, %c0_i32_0 : i32, i32
  }
  func.func @transform_5(%arg0: i32) -> (i32, i32) {
    %c0_i32 = arith.constant 0 : i32
    %c0_i32_0 = arith.constant 0 : i32
    return %arg0, %c0_i32 : i32, i32
  }
}

</mosaic_0001>

<bundles_post_ra>
// kernel: cqnn_forward.1
= control target key start
LH: loop header
LB: loop body
LE: loop exit
PB: predicated region body
PF: predicated region fallthrough
CT: control target
= control target key end

     0   :  { %10 = vsyncpa [#allocation3], 0  ;;  %s358_s18 = smov [#allocation2]   ;;  %s411_s0 = inlined_call_operand.vmem [shape: bf16[16,16], index: 0, kind: input, shape index: {}]   ;;  %s412_s1 = inlined_call_operand.vmem [shape: bf16[16,128], index: 1, kind: input, shape index: {}]   ;;  %s413_s2 = inlined_call_operand.vmem [shape: f32[1,128], index: 2, kind: input, shape index: {}]   ;;  %s414_s3 = inlined_call_operand.hbm [shape: bf16[128,128], index: 3, kind: input, shape index: {}]   ;;  %s415_s4 = inlined_call_operand.vmem [shape: f32[1,128], index: 4, kind: input, shape index: {}]   ;;  %s416_s5 = inlined_call_operand.vmem [shape: bf16[16,128], index: 5, kind: output, shape index: {}]  }
   0x1   :  { %s22_s19 = sshll.u32 %s358_s18, 4  ;;  %s23_s19 = int_to_ptr.vmem [resolvable:$true] %s22_s19 }
   0x2   :  { %s344_s20 = scalar_lea.vmem %s23_s19, 1024  ;;  %p349_p1 = scmp.lt.s32.totalorder %s23_s19, %s23_s19 }
   0x3   :  { %p345_p0 = scmp.ne.s32.totalorder %s23_s19, %s344_s20  ;;  %p350_p2 = scmp.lt.s32.totalorder %s344_s20, %s344_s20 }
   0x5   :  { %p351_p3 = por %p350_p2, %p349_p1 }
   0x7   :  { %p352_p4 = pnand %p351_p3, %p345_p0 }
   0x9   :  { %355 = shalt.err (!%p352_p4)
}
   0xa   :  { %s359_s21 = smov 64   ;;  %s360_s22 = smov 4  }
   0xb   :  { %28 = dma.hbm_to_vmem [thread:$0]  %s414_s3, 1024, %s23_s19, [#allocation3], %s359_s21, %s359_s21, %s360_s22  }
   0xc   :  { %356 = dma.done.wait [#allocation3], 1024  }
   0xd   :  { %357 = vsyncadd [#allocation3], 4294966272  ;;  %v361_v0 = vmov 0.0   ;;  %vm362_vm0 = vmmov 0   ;;  %v314_v1 = vld [vmem:[%s412_s1] sm:$0xff]   ;;  %vm57_vm1 = vcmask 130048  }
   0xe   :  { %283 = vmatprep.subr.bf16.mxu0 %v361_v0  ;;  %285 = vmatprep.mubr.msk.bf16.mxu0 %vm362_vm0, %v361_v0  ;;  %v315_v2 = vld [vmem:[%s411_s0] sm:$0xff]   ;;  %v316_v10 = vld [vmem:[#allocation2 + $0x38] sm:$0xff]   ;;  %v317_v11 = vld [vmem:[#allocation2 + $0x30] sm:$0xff]  }
   0xf   :  { %289 = vmatprep.subr.bf16.mxu1 %v361_v0  ;;  %305 = vmatprep.mubr.msk.bf16.mxu1 %vm362_vm0, %v361_v0  ;;  %v250_v3 = vld [vmem:[%s413_s2] ss:$0 sm:$0xff]  ;;  %v318_v12 = vld [vmem:[#allocation2 + $0x28] sm:$0xff]   ;;  %v320_v22 = vld [vmem:[#allocation2 + $0x18] sm:$0xff]  }
  0x10   :  { %284 = vmatpush3.bf16.msra.mxu0 %v314_v1  ;;  %290 = vmatpush3.bf16.msra.mxu1 %v316_v10  ;;  %v319_v21 = vld [vmem:[#allocation2 + $0x20] sm:$0xff]   ;;  %v321_v23 = vld [vmem:[#allocation2 + $0x10] sm:$0xff]   ;;  %v322_v24 = vld [vmem:[#allocation2 + $0x8] sm:$0xff]  }
  0x11   :  { %291 = vmatprep.subr.bf16.mxu1 %v361_v0  ;;  %v323_v25 = vld [vmem:[#allocation2] sm:$0xff]  }
  0x12   :  { %v254_v33 = vld [vmem:[%s415_s4] ss:$0 sm:$0xff] }
  0x13   :  { %286 = vmatmul.mubr.msk.bf16.vlgmr.msra.gmra.mxu0 %vm57_vm1, %v315_v2 }
  0x14   :  { %292 = vmatpush3.bf16.msra.mxu1 %v317_v11 }
  0x15   :  { %293 = vmatprep.subr.bf16.mxu1 %v361_v0 }
  0x18   :  { %294 = vmatpush3.bf16.msra.mxu1 %v318_v12 }
  0x19   :  { %295 = vmatprep.subr.bf16.mxu1 %v361_v0 }
  0x1c   :  { %296 = vmatpush3.bf16.msra.mxu1 %v319_v21 }
  0x1d   :  { %297 = vmatprep.subr.bf16.mxu1 %v361_v0 }
  0x20   :  { %298 = vmatpush3.bf16.msra.mxu1 %v320_v22 }
  0x21   :  { %299 = vmatprep.subr.bf16.mxu1 %v361_v0 }
  0x24   :  { %300 = vmatpush3.bf16.msra.mxu1 %v321_v23 }
  0x25   :  { %301 = vmatprep.subr.bf16.mxu1 %v361_v0 }
  0x28   :  { %302 = vmatpush3.bf16.msra.mxu1 %v322_v24 }
  0x29   :  { %303 = vmatprep.subr.bf16.mxu1 %v361_v0 }
  0x2c   :  { %304 = vmatpush3.bf16.msra.mxu1 %v323_v25 }
  0xd3   :  { %v95_v4 = vpop.f32.mrf.mxu0 }
  0xd4   :  { %v96_v5 = vadd.f32 %v250_v3, %v95_v4 }
  0xd5   :  { %v287_v6 = vpop.f32.mrf.mxu0 }
  0xd6   :  { %102 = vmax.xlane.f32.xlu0 %v96_v5 }
  0xd7   :  { %v98_v7 = vpop.f32.mrf.mxu0 }
  0xd8   :  { %v99_v8 = vadd.f32 %v250_v3, %v98_v7 }
  0xd9   :  { %v288_v9 = vpop.f32.mrf.mxu0 }
  0xda   :  { %104 = vmax.xlane.f32.xlu0 %v99_v8 }
 0x15f   :  { %v103_v13 = vpop.xlane.xlu0 %102 }
 0x160   :  { %v106_v14 = vsub.f32 %v96_v5, %v103_v13 }
 0x162   :  { %v108_v15 = vmul.f32 1.442695, %v106_v14 }
 0x163   :  { %v105_v16 = vpop.xlane.xlu0 %104 }
 0x164   :  { %324 = vpow2.f32 %v108_v15  ;;  %v107_v17 = vsub.f32 %v99_v8, %v105_v16 }
 0x166   :  { %v110_v18 = vmul.f32 1.442695, %v107_v17 }
 0x168   :  { %326 = vpow2.f32 %v110_v18 }
 0x171   :  { %v325_v19 = vpop.eup %324 }
 0x172   :  { %112 = vadd.xlane.f32.xlu1 %v325_v19 }
 0x175   :  { %v327_v20 = vpop.eup %326 }
 0x176   :  { %114 = vadd.xlane.f32.xlu1 %v327_v20 }
 0x1fb   :  { %v113_v26 = vpop.xlane.xlu1 %112 }
 0x1fc   :  { %328 = vrcp.f32 %v113_v26 }
 0x1ff   :  { %v115_v27 = vpop.xlane.xlu1 %114 }
 0x200   :  { %330 = vrcp.f32 %v115_v27 }
 0x209   :  { %v329_v28 = vpop.eup %328 }
 0x20a   :  { %v118_v30 = vmul.f32 %v329_v28, %v325_v19 }
 0x20d   :  { %v331_v29 = vpop.eup %330 }
 0x20e   :  { %v119_v31 = vmul.f32 %v331_v29, %v327_v20 }
 0x210   :  { %v120_v32 = vpack.c.bf16 %v119_v31, %v118_v30 }
 0x212   :  { %306 = vmatmul.mubr.bf16.vlgmr.msra.gmra.mxu1 %v120_v32 }
 0x2d2   :  { %v226_v34 = vpop.f32.mrf.mxu1 }
 0x2d3   :  { %v227_v35 = vadd.f32 %v254_v33, %v226_v34 }
 0x2d4   :  { %v307_v36 = vpop.f32.mrf.mxu1 }
 0x2d5   :  { %332 = vtanh.f32 %v227_v35 }
 0x2d6   :  { %v229_v37 = vpop.f32.mrf.mxu1 }
 0x2d7   :  { %v230_v38 = vadd.f32 %v254_v33, %v229_v37 }
 0x2d8   :  { %v308_v39 = vpop.f32.mrf.mxu1 }
 0x2d9   :  { %334 = vtanh.f32 %v230_v38 }
 0x2e2   :  { %v333_v40 = vpop.eup %332 }
 0x2e6   :  { %v335_v41 = vpop.eup %334 }
 0x2e7   :  { %v270_v42 = vpack.c.bf16 %v335_v41, %v333_v40 }
 0x2e9   :  { %271 = vst [vmem:[%s416_s5] sm:$0xff] %v270_v42  }
 0x2ea   :  { %249 = vsyncpa [#allocation3], 1 }

</bundles_post_ra>
